<compile_context>
chip_gen: v5e
topology: v5e:2x2
jax: 0.10.0
libtpu: 0.0.40
codegen_flags: <defaults>
</compile_context>

<pallas_src>
import functools
from math import sqrt

import jax
import jax.numpy as jnp
from jax.experimental import pallas as pl
from jax.experimental.pallas import tpu as pltpu


LANE = 128  # TPU lane width; output channels are padded to a multiple of this.


def _round_up(x, m):
    return ((x + m - 1) // m) * m


N_BOXES = {"conv4_3": 4, "conv5_3": 6}
CIN_4_3 = 64   # TinyNet.cfg[9]
CIN_5_3 = 64   # TinyNet.cfg[12]


# ----------------------------------------------------------------------------
# Pallas kernel: one batch image per grid step, both heads per step.
#   x4_ref: (H4+2, W4+2, 64) bf16   spatially padded conv4_3 features (1 image)
#   x5_ref: (H5+2, W5+2, 64) bf16   spatially padded conv5_3 features (1 image)
#   w4_ref: (9*64, 128) bf16        fused loc+cls weights, tap-major rows
#   w5_ref: (9*64, 128) bf16
#   o4_ref: (H4*W4, 128) f32        per-image output (lane-dense padded channels)
#   o5_ref: (H5*W5, 128) f32
# ----------------------------------------------------------------------------
def _pred_heads_kernel(x4_ref, x5_ref, w4_ref, w5_ref, o4_ref, o5_ref):
    def head(x_ref, w_ref, o_ref):
        hp, wp, c = x_ref.shape
        h, w = hp - 2, wp - 2
        m = h * w
        cout = o_ref.shape[-1]
        xp = x_ref[...]                                  # whole padded map in VMEM
        taps = [xp[dy:dy + h, dx:dx + w, :].reshape(m, c)
                for dy in range(3) for dx in range(3)]
        acc = jnp.zeros((m, cout), jnp.float32)
        # Pack consecutive 64-channel taps pairwise into 128-wide K blocks:
        # 4 full-K (=128) MXU pushes, then one K=64 push for the ninth tap.
        # No zero-padded K rows -> no wasted multiplies, no stale-VMEM concerns.
        for b in range(4):
            pair = jnp.concatenate([taps[2 * b], taps[2 * b + 1]], axis=-1)
            acc += jnp.dot(pair, w_ref[2 * b * c:(2 * b + 2) * c, :],
                           preferred_element_type=jnp.float32)
        acc += jnp.dot(taps[8], w_ref[8 * c:9 * c, :],
                       preferred_element_type=jnp.float32)
        o_ref[...] = acc.astype(o_ref.dtype)

    head(x4_ref, w4_ref, o4_ref)
    head(x5_ref, w5_ref, o5_ref)


# ----------------------------------------------------------------------------
# Parameters (PyTorch OIHW layout) and one-time weight preparation.
# ----------------------------------------------------------------------------
def init_prediction_conv_params(key, n_classes, dtype=jnp.float32):
    """Kaiming-uniform init (fan_in mode, a=0), PyTorch OIHW weight layout."""
    def kaiming(key, cout, cin):
        fan_in = cin * 3 * 3
        bound = sqrt(6.0 / fan_in)
        return jax.random.uniform(key, (cout, cin, 3, 3), dtype,
                                  minval=-bound, maxval=bound)

    k1, k2, k3, k4 = jax.random.split(key, 4)
    return {
        "loc_conv4_3": kaiming(k1, N_BOXES["conv4_3"] * 4, CIN_4_3),
        "loc_conv5_3": kaiming(k2, N_BOXES["conv5_3"] * 4, CIN_5_3),
        "cl_conv4_3": kaiming(k3, N_BOXES["conv4_3"] * n_classes, CIN_4_3),
        "cl_conv5_3": kaiming(k4, N_BOXES["conv5_3"] * n_classes, CIN_5_3),
    }


def prepare_prediction_weights(params, compute_dtype=jnp.bfloat16):
    """One-time prep (hoisted out of the per-call jit path).

    Fuses loc + class heads per feature map, converts OIHW -> tap-major
    (9*Cin, Cout_pad) in bf16.  Rows [t*Cin, (t+1)*Cin) hold tap t = ky*3+kx, so
    consecutive tap pairs form the 128-row K blocks the kernel consumes; only
    the OUTPUT channel axis is zero-padded (to a lane multiple), no padded K.
    """
    def prep(w_loc, w_cl):
        w = jnp.concatenate([w_loc, w_cl], axis=0)          # (Cout, Cin, 3, 3)
        cout, cin = int(w.shape[0]), int(w.shape[1])
        cp_out = _round_up(cout, LANE)
        w = jnp.transpose(w, (2, 3, 1, 0)).reshape(9 * cin, cout)  # tap-major K
        w_full = jnp.zeros((9 * cin, cp_out), compute_dtype)
        return w_full.at[:, :cout].set(w.astype(compute_dtype))

    w4p = prep(params["loc_conv4_3"], params["cl_conv4_3"])
    w5p = prep(params["loc_conv5_3"], params["cl_conv5_3"])
    return w4p, w5p


# ----------------------------------------------------------------------------
# Forward pass.
# ----------------------------------------------------------------------------
@functools.partial(jax.jit, static_argnames=("n_classes",))
def prediction_convolutions_forward(conv4_3_feats, conv5_3_feats, w4p, w5p,
                                    n_classes):
    """conv4_3_feats: (N,H4,W4,64) NHWC, conv5_3_feats: (N,H5,W5,64) NHWC."""
    N, H4, W4, C4 = conv4_3_feats.shape
    _, H5, W5, C5 = conv5_3_feats.shape
    M4, M5 = H4 * W4, H5 * W5
    CP4, CP5 = int(w4p.shape[1]), int(w5p.shape[1])
    compute_dtype = w4p.dtype
    out_dtype = jnp.float32

    # +1 spatial border pad fused with the bf16 cast (channel pad dropped).
    # TODO(synk): the border pad could move in-kernel (zero a VMEM scratch once,
    # DMA the unpadded map into its interior) to save one HBM round-trip of the
    # activations; at prediction-head sizes that traffic is tens of KB.
    x4p = jnp.pad(conv4_3_feats, ((0, 0), (1, 1), (1, 1), (0, 0))).astype(compute_dtype)
    x5p = jnp.pad(conv5_3_feats, ((0, 0), (1, 1), (1, 1), (0, 0))).astype(compute_dtype)

    itemsize = jnp.dtype(compute_dtype).itemsize
    flops = 2 * N * (M4 * 9 * C4 * CP4 + M5 * 9 * C5 * CP5)
    bytes_accessed = int((x4p.size + x5p.size + w4p.size + w5p.size) * itemsize
                         + (N * M4 * CP4 + N * M5 * CP5) * 4)

    out4, out5 = pl.pallas_call(
        _pred_heads_kernel,
        out_shape=(jax.ShapeDtypeStruct((N, M4, CP4), out_dtype),
                   jax.ShapeDtypeStruct((N, M5, CP5), out_dtype)),
        grid_spec=pltpu.PrefetchScalarGridSpec(
            num_scalar_prefetch=0,
            grid=(N,),
            in_specs=[
                pl.BlockSpec((None, H4 + 2, W4 + 2, C4), lambda n: (n, 0, 0, 0)),
                pl.BlockSpec((None, H5 + 2, W5 + 2, C5), lambda n: (n, 0, 0, 0)),
                pl.BlockSpec(w4p.shape, lambda n: (0, 0)),   # weights stay resident
                pl.BlockSpec(w5p.shape, lambda n: (0, 0)),
            ],
            out_specs=[
                pl.BlockSpec((None, M4, CP4), lambda n: (n, 0, 0)),
                pl.BlockSpec((None, M5, CP5), lambda n: (n, 0, 0)),
            ]),
        compiler_params=pltpu.CompilerParams(
            dimension_semantics=("parallel",),       # megacore-shardable on v7x
            vmem_limit_bytes=32 * 1024 * 1024),
        cost_estimate=pl.CostEstimate(flops=flops, transcendentals=0,
                                      bytes_accessed=bytes_accessed),
    )(x4p, x5p, w4p, w5p)

    loc4_c = N_BOXES["conv4_3"] * 4
    cl4_c = N_BOXES["conv4_3"] * n_classes
    loc5_c = N_BOXES["conv5_3"] * 4
    cl5_c = N_BOXES["conv5_3"] * n_classes

    # Slice off zero-padded output channels, then match PyTorch's
    # permute(0,2,3,1).view(N, -1, k) ordering.
    l4 = out4[:, :, :loc4_c].reshape(N, -1, 4)
    c4 = out4[:, :, loc4_c:loc4_c + cl4_c].reshape(N, -1, n_classes)
    l5 = out5[:, :, :loc5_c].reshape(N, -1, 4)
    c5 = out5[:, :, loc5_c:loc5_c + cl5_c].reshape(N, -1, n_classes)

    locs = jnp.concatenate([l4, l5], axis=1)
    classes_scores = jnp.concatenate([c4, c5], axis=1)
    return locs, classes_scores


# ----------------------------------------------------------------------------
# Pure-JAX reference (for correctness check; f32 weights, f32 activations).
# ----------------------------------------------------------------------------
def _ref_conv(x_nhwc, w_oihw):
    w_hwio = jnp.transpose(w_oihw, (2, 3, 1, 0))
    return jax.lax.conv_general_dilated(
        x_nhwc, w_hwio, window_strides=(1, 1), padding="SAME",
        dimension_numbers=("NHWC", "HWIO", "NHWC"))


def _ref_forward(conv4, conv5, params, n_classes):
    N = conv4.shape[0]
    l4 = _ref_conv(conv4, params["loc_conv4_3"]).reshape(N, -1, 4)
    l5 = _ref_conv(conv5, params["loc_conv5_3"]).reshape(N, -1, 4)
    c4 = _ref_conv(conv4, params["cl_conv4_3"]).reshape(N, -1, n_classes)
    c5 = _ref_conv(conv5, params["cl_conv5_3"]).reshape(N, -1, n_classes)
    return (jnp.concatenate([l4, l5], axis=1),
            jnp.concatenate([c4, c5], axis=1))


if __name__ == "__main__":
    n_classes = 8
    N = 2
    H4 = W4 = 8   # conv4_3 feature map (small, consistent with TinyNet scale)
    H5 = W5 = 4   # conv5_3 feature map

    key = jax.random.PRNGKey(0)
    k_f4, k_f5, k_p = jax.random.split(key, 3)
    conv4_3_feats = jax.random.normal(k_f4, (N, H4, W4, CIN_4_3), jnp.float32)
    conv5_3_feats = jax.random.normal(k_f5, (N, H5, W5, CIN_5_3), jnp.float32)
    params = init_prediction_conv_params(k_p, n_classes)

    # One-time weight preparation (hoisted out of the per-call jit path).
    w4p, w5p = prepare_prediction_weights(params)
    jax.block_until_ready((w4p, w5p))

    locs, classes_scores = prediction_convolutions_forward(
        conv4_3_feats, conv5_3_feats, w4p, w5p, n_classes)
    jax.block_until_ready((locs, classes_scores))

    # Shape check: 8*8*4 + 4*4*6 = 256 + 96 = 352 priors.
    assert locs.shape == (N, 352, 4), locs.shape
    assert classes_scores.shape == (N, 352, n_classes), classes_scores.shape

    # Numerical check vs. f32 XLA conv reference (kernel runs bf16 operands with
    # f32 accumulation, so tolerances are bf16-scale).
    ref_locs, ref_cls = _ref_forward(conv4_3_feats, conv5_3_feats, params,
                                     n_classes)
    assert jnp.allclose(locs, ref_locs, atol=1e-1, rtol=1e-1), (
        float(jnp.max(jnp.abs(locs - ref_locs))))
    assert jnp.allclose(classes_scores, ref_cls, atol=1e-1, rtol=1e-1), (
        float(jnp.max(jnp.abs(classes_scores - ref_cls))))

    print("KERNEL_OK")
</pallas_src>

<mosaic_0001>
module attributes {stable_mosaic.version = 11 : i64} {
  func.func @_pred_heads_kernel(%arg0: i32, %arg1: memref<1x10x10x64xbf16, #tpu.memory_space<vmem>>, %arg2: memref<1x6x6x64xbf16, #tpu.memory_space<vmem>>, %arg3: memref<576x128xbf16, #tpu.memory_space<vmem>>, %arg4: memref<576x128xbf16, #tpu.memory_space<vmem>>, %arg5: memref<1x64x128xf32, #tpu.memory_space<vmem>>, %arg6: memref<1x16x128xf32, #tpu.memory_space<vmem>>) attributes {dimension_semantics = [#tpu.dimension_semantics<parallel>], iteration_bounds = array<i64: 2>, scalar_prefetch = 0 : i64, scratch_operands = 0 : i64, tpu.core_type = #tpu.core_type<tc>, window_params = [{transform_indices = @transform_0, window_bounds = array<i64: 1, 10, 10, 64>}, {transform_indices = @transform_1, window_bounds = array<i64: 1, 6, 6, 64>}, {pipeline_mode = #tpu.pipeline_mode<synchronous>, transform_indices = @transform_2, window_bounds = array<i64: 576, 128>}, {pipeline_mode = #tpu.pipeline_mode<synchronous>, transform_indices = @transform_3, window_bounds = array<i64: 576, 128>}, {transform_indices = @transform_4, window_bounds = array<i64: 1, 64, 128>}, {transform_indices = @transform_5, window_bounds = array<i64: 1, 16, 128>}]} {
    %c0 = arith.constant 0 : index
    %c0_0 = arith.constant 0 : index
    %c0_1 = arith.constant 0 : index
    %c0_2 = arith.constant 0 : index
    %0 = vector.load %arg1[%c0, %c0_0, %c0_1, %c0_2] : memref<1x10x10x64xbf16, #tpu.memory_space<vmem>>, vector<1x10x10x64xbf16>
    %1 = vector.shape_cast %0 : vector<1x10x10x64xbf16> to vector<10x10x64xbf16>
    %2 = vector.extract_strided_slice %1 {offsets = [0, 0, 0], sizes = [8, 8, 64], strides = [1, 1, 1]} : vector<10x10x64xbf16> to vector<8x8x64xbf16>
    %3 = vector.shape_cast %2 : vector<8x8x64xbf16> to vector<64x64xbf16>
    %4 = vector.extract_strided_slice %1 {offsets = [0, 1, 0], sizes = [8, 8, 64], strides = [1, 1, 1]} : vector<10x10x64xbf16> to vector<8x8x64xbf16>
    %5 = vector.shape_cast %4 : vector<8x8x64xbf16> to vector<64x64xbf16>
    %6 = vector.extract_strided_slice %1 {offsets = [0, 2, 0], sizes = [8, 8, 64], strides = [1, 1, 1]} : vector<10x10x64xbf16> to vector<8x8x64xbf16>
    %7 = vector.shape_cast %6 : vector<8x8x64xbf16> to vector<64x64xbf16>
    %8 = vector.extract_strided_slice %1 {offsets = [1, 0, 0], sizes = [8, 8, 64], strides = [1, 1, 1]} : vector<10x10x64xbf16> to vector<8x8x64xbf16>
    %9 = vector.shape_cast %8 : vector<8x8x64xbf16> to vector<64x64xbf16>
    %10 = vector.extract_strided_slice %1 {offsets = [1, 1, 0], sizes = [8, 8, 64], strides = [1, 1, 1]} : vector<10x10x64xbf16> to vector<8x8x64xbf16>
    %11 = vector.shape_cast %10 : vector<8x8x64xbf16> to vector<64x64xbf16>
    %12 = vector.extract_strided_slice %1 {offsets = [1, 2, 0], sizes = [8, 8, 64], strides = [1, 1, 1]} : vector<10x10x64xbf16> to vector<8x8x64xbf16>
    %13 = vector.shape_cast %12 : vector<8x8x64xbf16> to vector<64x64xbf16>
    %14 = vector.extract_strided_slice %1 {offsets = [2, 0, 0], sizes = [8, 8, 64], strides = [1, 1, 1]} : vector<10x10x64xbf16> to vector<8x8x64xbf16>
    %15 = vector.shape_cast %14 : vector<8x8x64xbf16> to vector<64x64xbf16>
    %16 = vector.extract_strided_slice %1 {offsets = [2, 1, 0], sizes = [8, 8, 64], strides = [1, 1, 1]} : vector<10x10x64xbf16> to vector<8x8x64xbf16>
    %17 = vector.shape_cast %16 : vector<8x8x64xbf16> to vector<64x64xbf16>
    %18 = vector.extract_strided_slice %1 {offsets = [2, 2, 0], sizes = [8, 8, 64], strides = [1, 1, 1]} : vector<10x10x64xbf16> to vector<8x8x64xbf16>
    %19 = vector.shape_cast %18 : vector<8x8x64xbf16> to vector<64x64xbf16>
    %cst = arith.constant 0.000000e+00 : f32
    %20 = vector.broadcast %cst : f32 to vector<64x128xf32>
    %21 = tpu.concatenate %3, %5 in 1 : vector<64x64xbf16>, vector<64x64xbf16> -> vector<64x128xbf16>
    %c0_3 = arith.constant 0 : index
    %c0_4 = arith.constant 0 : index
    %22 = vector.load %arg3[%c0_3, %c0_4] : memref<576x128xbf16, #tpu.memory_space<vmem>>, vector<128x128xbf16>
    %cst_5 = arith.constant dense<0.000000e+00> : vector<64x128xf32>
    %23 = tpu.matmul %21, %22, %cst_5 {dimension_numbers = #tpu.dot_dimension_numbers<[1], [0], [0], [1], [0, 0, 1, 1], [], []>} : vector<64x128xbf16>, vector<128x128xbf16>, vector<64x128xf32> -> vector<64x128xf32>
    %24 = arith.addf %20, %23 : vector<64x128xf32>
    %25 = tpu.concatenate %7, %9 in 1 : vector<64x64xbf16>, vector<64x64xbf16> -> vector<64x128xbf16>
    %c128 = arith.constant 128 : index
    %c0_6 = arith.constant 0 : index
    %26 = vector.load %arg3[%c128, %c0_6] : memref<576x128xbf16, #tpu.memory_space<vmem>>, vector<128x128xbf16>
    %cst_7 = arith.constant dense<0.000000e+00> : vector<64x128xf32>
    %27 = tpu.matmul %25, %26, %cst_7 {dimension_numbers = #tpu.dot_dimension_numbers<[1], [0], [0], [1], [0, 0, 1, 1], [], []>} : vector<64x128xbf16>, vector<128x128xbf16>, vector<64x128xf32> -> vector<64x128xf32>
    %28 = arith.addf %24, %27 : vector<64x128xf32>
    %29 = tpu.concatenate %11, %13 in 1 : vector<64x64xbf16>, vector<64x64xbf16> -> vector<64x128xbf16>
    %c256 = arith.constant 256 : index
    %c0_8 = arith.constant 0 : index
    %30 = vector.load %arg3[%c256, %c0_8] : memref<576x128xbf16, #tpu.memory_space<vmem>>, vector<128x128xbf16>
    %cst_9 = arith.constant dense<0.000000e+00> : vector<64x128xf32>
    %31 = tpu.matmul %29, %30, %cst_9 {dimension_numbers = #tpu.dot_dimension_numbers<[1], [0], [0], [1], [0, 0, 1, 1], [], []>} : vector<64x128xbf16>, vector<128x128xbf16>, vector<64x128xf32> -> vector<64x128xf32>
    %32 = arith.addf %28, %31 : vector<64x128xf32>
    %33 = tpu.concatenate %15, %17 in 1 : vector<64x64xbf16>, vector<64x64xbf16> -> vector<64x128xbf16>
    %c384 = arith.constant 384 : index
    %c0_10 = arith.constant 0 : index
    %34 = vector.load %arg3[%c384, %c0_10] : memref<576x128xbf16, #tpu.memory_space<vmem>>, vector<128x128xbf16>
    %cst_11 = arith.constant dense<0.000000e+00> : vector<64x128xf32>
    %35 = tpu.matmul %33, %34, %cst_11 {dimension_numbers = #tpu.dot_dimension_numbers<[1], [0], [0], [1], [0, 0, 1, 1], [], []>} : vector<64x128xbf16>, vector<128x128xbf16>, vector<64x128xf32> -> vector<64x128xf32>
    %36 = arith.addf %32, %35 : vector<64x128xf32>
    %c512 = arith.constant 512 : index
    %c0_12 = arith.constant 0 : index
    %37 = vector.load %arg3[%c512, %c0_12] : memref<576x128xbf16, #tpu.memory_space<vmem>>, vector<64x128xbf16>
    %cst_13 = arith.constant dense<0.000000e+00> : vector<64x128xf32>
    %38 = tpu.matmul %19, %37, %cst_13 {dimension_numbers = #tpu.dot_dimension_numbers<[1], [0], [0], [1], [0, 0, 1, 1], [], []>} : vector<64x64xbf16>, vector<64x128xbf16>, vector<64x128xf32> -> vector<64x128xf32>
    %39 = arith.addf %36, %38 : vector<64x128xf32>
    %c0_14 = arith.constant 0 : index
    %c0_15 = arith.constant 0 : index
    %c0_16 = arith.constant 0 : index
    %40 = vector.load %arg5[%c0_14, %c0_15, %c0_16] : memref<1x64x128xf32, #tpu.memory_space<vmem>>, vector<1x64x128xf32>
    %41 = vector.shape_cast %40 : vector<1x64x128xf32> to vector<64x128xf32>
    %42 = vector.shape_cast %39 : vector<64x128xf32> to vector<1x64x128xf32>
    tpu.vector_store %arg5[%c0_14, %c0_15, %c0_16], %42 {strides = array<i32>} : memref<1x64x128xf32, #tpu.memory_space<vmem>>, vector<1x64x128xf32>,
    %c0_17 = arith.constant 0 : index
    %c0_18 = arith.constant 0 : index
    %c0_19 = arith.constant 0 : index
    %c0_20 = arith.constant 0 : index
    %43 = vector.load %arg2[%c0_17, %c0_18, %c0_19, %c0_20] : memref<1x6x6x64xbf16, #tpu.memory_space<vmem>>, vector<1x6x6x64xbf16>
    %44 = vector.shape_cast %43 : vector<1x6x6x64xbf16> to vector<6x6x64xbf16>
    %45 = vector.extract_strided_slice %44 {offsets = [0, 0, 0], sizes = [4, 4, 64], strides = [1, 1, 1]} : vector<6x6x64xbf16> to vector<4x4x64xbf16>
    %46 = vector.shape_cast %45 : vector<4x4x64xbf16> to vector<16x64xbf16>
    %47 = vector.extract_strided_slice %44 {offsets = [0, 1, 0], sizes = [4, 4, 64], strides = [1, 1, 1]} : vector<6x6x64xbf16> to vector<4x4x64xbf16>
    %48 = vector.shape_cast %47 : vector<4x4x64xbf16> to vector<16x64xbf16>
    %49 = vector.extract_strided_slice %44 {offsets = [0, 2, 0], sizes = [4, 4, 64], strides = [1, 1, 1]} : vector<6x6x64xbf16> to vector<4x4x64xbf16>
    %50 = vector.shape_cast %49 : vector<4x4x64xbf16> to vector<16x64xbf16>
    %51 = vector.extract_strided_slice %44 {offsets = [1, 0, 0], sizes = [4, 4, 64], strides = [1, 1, 1]} : vector<6x6x64xbf16> to vector<4x4x64xbf16>
    %52 = vector.shape_cast %51 : vector<4x4x64xbf16> to vector<16x64xbf16>
    %53 = vector.extract_strided_slice %44 {offsets = [1, 1, 0], sizes = [4, 4, 64], strides = [1, 1, 1]} : vector<6x6x64xbf16> to vector<4x4x64xbf16>
    %54 = vector.shape_cast %53 : vector<4x4x64xbf16> to vector<16x64xbf16>
    %55 = vector.extract_strided_slice %44 {offsets = [1, 2, 0], sizes = [4, 4, 64], strides = [1, 1, 1]} : vector<6x6x64xbf16> to vector<4x4x64xbf16>
    %56 = vector.shape_cast %55 : vector<4x4x64xbf16> to vector<16x64xbf16>
    %57 = vector.extract_strided_slice %44 {offsets = [2, 0, 0], sizes = [4, 4, 64], strides = [1, 1, 1]} : vector<6x6x64xbf16> to vector<4x4x64xbf16>
    %58 = vector.shape_cast %57 : vector<4x4x64xbf16> to vector<16x64xbf16>
    %59 = vector.extract_strided_slice %44 {offsets = [2, 1, 0], sizes = [4, 4, 64], strides = [1, 1, 1]} : vector<6x6x64xbf16> to vector<4x4x64xbf16>
    %60 = vector.shape_cast %59 : vector<4x4x64xbf16> to vector<16x64xbf16>
    %61 = vector.extract_strided_slice %44 {offsets = [2, 2, 0], sizes = [4, 4, 64], strides = [1, 1, 1]} : vector<6x6x64xbf16> to vector<4x4x64xbf16>
    %62 = vector.shape_cast %61 : vector<4x4x64xbf16> to vector<16x64xbf16>
    %cst_21 = arith.constant 0.000000e+00 : f32
    %63 = vector.broadcast %cst_21 : f32 to vector<16x128xf32>
    %64 = tpu.concatenate %46, %48 in 1 : vector<16x64xbf16>, vector<16x64xbf16> -> vector<16x128xbf16>
    %c0_22 = arith.constant 0 : index
    %c0_23 = arith.constant 0 : index
    %65 = vector.load %arg4[%c0_22, %c0_23] : memref<576x128xbf16, #tpu.memory_space<vmem>>, vector<128x128xbf16>
    %cst_24 = arith.constant dense<0.000000e+00> : vector<16x128xf32>
    %66 = tpu.matmul %64, %65, %cst_24 {dimension_numbers = #tpu.dot_dimension_numbers<[1], [0], [0], [1], [0, 0, 1, 1], [], []>} : vector<16x128xbf16>, vector<128x128xbf16>, vector<16x128xf32> -> vector<16x128xf32>
    %67 = arith.addf %63, %66 : vector<16x128xf32>
    %68 = tpu.concatenate %50, %52 in 1 : vector<16x64xbf16>, vector<16x64xbf16> -> vector<16x128xbf16>
    %c128_25 = arith.constant 128 : index
    %c0_26 = arith.constant 0 : index
    %69 = vector.load %arg4[%c128_25, %c0_26] : memref<576x128xbf16, #tpu.memory_space<vmem>>, vector<128x128xbf16>
    %cst_27 = arith.constant dense<0.000000e+00> : vector<16x128xf32>
    %70 = tpu.matmul %68, %69, %cst_27 {dimension_numbers = #tpu.dot_dimension_numbers<[1], [0], [0], [1], [0, 0, 1, 1], [], []>} : vector<16x128xbf16>, vector<128x128xbf16>, vector<16x128xf32> -> vector<16x128xf32>
    %71 = arith.addf %67, %70 : vector<16x128xf32>
    %72 = tpu.concatenate %54, %56 in 1 : vector<16x64xbf16>, vector<16x64xbf16> -> vector<16x128xbf16>
    %c256_28 = arith.constant 256 : index
    %c0_29 = arith.constant 0 : index
    %73 = vector.load %arg4[%c256_28, %c0_29] : memref<576x128xbf16, #tpu.memory_space<vmem>>, vector<128x128xbf16>
    %cst_30 = arith.constant dense<0.000000e+00> : vector<16x128xf32>
    %74 = tpu.matmul %72, %73, %cst_30 {dimension_numbers = #tpu.dot_dimension_numbers<[1], [0], [0], [1], [0, 0, 1, 1], [], []>} : vector<16x128xbf16>, vector<128x128xbf16>, vector<16x128xf32> -> vector<16x128xf32>
    %75 = arith.addf %71, %74 : vector<16x128xf32>
    %76 = tpu.concatenate %58, %60 in 1 : vector<16x64xbf16>, vector<16x64xbf16> -> vector<16x128xbf16>
    %c384_31 = arith.constant 384 : index
    %c0_32 = arith.constant 0 : index
    %77 = vector.load %arg4[%c384_31, %c0_32] : memref<576x128xbf16, #tpu.memory_space<vmem>>, vector<128x128xbf16>
    %cst_33 = arith.constant dense<0.000000e+00> : vector<16x128xf32>
    %78 = tpu.matmul %76, %77, %cst_33 {dimension_numbers = #tpu.dot_dimension_numbers<[1], [0], [0], [1], [0, 0, 1, 1], [], []>} : vector<16x128xbf16>, vector<128x128xbf16>, vector<16x128xf32> -> vector<16x128xf32>
    %79 = arith.addf %75, %78 : vector<16x128xf32>
    %c512_34 = arith.constant 512 : index
    %c0_35 = arith.constant 0 : index
    %80 = vector.load %arg4[%c512_34, %c0_35] : memref<576x128xbf16, #tpu.memory_space<vmem>>, vector<64x128xbf16>
    %cst_36 = arith.constant dense<0.000000e+00> : vector<16x128xf32>
    %81 = tpu.matmul %62, %80, %cst_36 {dimension_numbers = #tpu.dot_dimension_numbers<[1], [0], [0], [1], [0, 0, 1, 1], [], []>} : vector<16x64xbf16>, vector<64x128xbf16>, vector<16x128xf32> -> vector<16x128xf32>
    %82 = arith.addf %79, %81 : vector<16x128xf32>
    %c0_37 = arith.constant 0 : index
    %c0_38 = arith.constant 0 : index
    %c0_39 = arith.constant 0 : index
    %83 = vector.load %arg6[%c0_37, %c0_38, %c0_39] : memref<1x16x128xf32, #tpu.memory_space<vmem>>, vector<1x16x128xf32>
    %84 = vector.shape_cast %83 : vector<1x16x128xf32> to vector<16x128xf32>
    %85 = vector.shape_cast %82 : vector<16x128xf32> to vector<1x16x128xf32>
    tpu.vector_store %arg6[%c0_37, %c0_38, %c0_39], %85 {strides = array<i32>} : memref<1x16x128xf32, #tpu.memory_space<vmem>>, vector<1x16x128xf32>,
    return
  }
  func.func @transform_0(%arg0: i32) -> (i32, i32, i32, i32) {
    %c0_i32 = arith.constant 0 : i32
    %c0_i32_0 = arith.constant 0 : i32
    %c0_i32_1 = arith.constant 0 : i32
    %c0_i32_2 = arith.constant 0 : i32
    return %arg0, %c0_i32, %c0_i32_0, %c0_i32_1 : i32, i32, i32, i32
  }
  func.func @transform_1(%arg0: i32) -> (i32, i32, i32, i32) {
    %c0_i32 = arith.constant 0 : i32
    %c0_i32_0 = arith.constant 0 : i32
    %c0_i32_1 = arith.constant 0 : i32
    %c0_i32_2 = arith.constant 0 : i32
    return %arg0, %c0_i32, %c0_i32_0, %c0_i32_1 : i32, i32, i32, i32
  }
  func.func @transform_2(%arg0: i32) -> (i32, i32) {
    %c0_i32 = arith.constant 0 : i32
    %c0_i32_0 = arith.constant 0 : i32
    %c0_i32_1 = arith.constant 0 : i32
    return %c0_i32, %c0_i32_0 : i32, i32
  }
  func.func @transform_3(%arg0: i32) -> (i32, i32) {
    %c0_i32 = arith.constant 0 : i32
    %c0_i32_0 = arith.constant 0 : i32
    %c0_i32_1 = arith.constant 0 : i32
    return %c0_i32, %c0_i32_0 : i32, i32
  }
  func.func @transform_4(%arg0: i32) -> (i32, i32, i32) {
    %c0_i32 = arith.constant 0 : i32
    %c0_i32_0 = arith.constant 0 : i32
    %c0_i32_1 = arith.constant 0 : i32
    return %arg0, %c0_i32, %c0_i32_0 : i32, i32, i32
  }
  func.func @transform_5(%arg0: i32) -> (i32, i32, i32) {
    %c0_i32 = arith.constant 0 : i32
    %c0_i32_0 = arith.constant 0 : i32
    %c0_i32_1 = arith.constant 0 : i32
    return %arg0, %c0_i32, %c0_i32_0 : i32, i32, i32
  }
}

</mosaic_0001>

<bundles_post_ra>
// kernel: prediction_convolutions_forward.1
= control target key start
LH: loop header
LB: loop body
LE: loop exit
PB: predicated region body
PF: predicated region fallthrough
CT: control target
= control target key end

     0   :  { %11 = vsyncpa [#allocation3], 0  ;;  %s2376_s18 = smov 0   ;;  %s3066_s0 = inlined_call_operand.vmem [shape: bf16[2,10,10,64], index: 0, kind: input, shape index: {}]   ;;  %s3067_s1 = inlined_call_operand.vmem [shape: bf16[2,6,6,64], index: 1, kind: input, shape index: {}]   ;;  %s3068_s2 = inlined_call_operand.vmem [shape: bf16[576,128], index: 2, kind: input, shape index: {}]   ;;  %s3069_s3 = inlined_call_operand.hbm [shape: bf16[576,128], index: 3, kind: input, shape index: {}]   ;;  %s3070_s4 = inlined_call_operand.vmem [shape: f32[2,64,128], index: 4, kind: output, shape index: {0}]   ;;  %s3071_s5 = inlined_call_operand.vmem [shape: f32[2,16,128], index: 5, kind: output, shape index: {1}]  }
   0x1 LB: > { %s182_s21 = sshll.u32 %s3069_s3, 4  ;;  %s1878_s22 = sadd.s32 4294967295, %s2340_s18   ;;  %s2340_s18 = sphi %s2376_s18, %s17_s18   ;;  %s183_s21 = int_to_ptr.hbm [resolvable:$true] %s182_s21 }
   0x2   : > { %p1880_p0 = scmp.ge.s32.totalorder %s2340_s18, 1  ;;  %p168_p1 = scmp.lt.s32.totalorder %s2340_s18, 3 }
   0x3   : > { %p2286_p2 = scmp.eq.s32.totalorder %s1878_s22, 0  ;;  %s2342_s23 = smov [#allocation2]  }
   0x4   : > { %p169_p3 = pnand %p1880_p0, %p168_p1  ;;  %s184_s24 = sshll.u32 %s2342_s23, 4  ;;  %s185_s24 = int_to_ptr.vmem [resolvable:$true] %s184_s24 }
   0x5   : > { %s2343_s25 = smov 64   ;;  %s2344_s26 = smov 4  }
   0x6   : > { %p2282_p4 = pneg %p169_p3  ;;  %216 = sbr.rel (%p169_p3) target bundleno = 395 (0x18b), region = 36 }
   0x8   : > { %p2283_p5 = pnand %p2286_p2, %p2282_p4 }
   0xa   : > { %2285 = dma.hbm_to_vmem [thread:$0]  (!%p2283_p5), %s183_s21, 4608, %s185_s24, [#allocation3], %s2343_s25, %s2343_s25, %s2344_s26  }
   0xb   : > { %2335 = dma.done.wait (%p2286_p2), [#allocation3], 4608  }
   0xc   : > { %2337 = vsyncadd (%p2286_p2), [#allocation3], 4294962688  ;;  %p255_p6 = scmp.lt.s32.totalorder %s1878_s22, 1  ;;  %vm1126_vm0 = vcmask 1041408   ;;  %vm1130_vm1 = vcmask 1043458   ;;  %s2345_s10 = smov 64  }
   0xd   : > { %vm1152_vm2 = vsmask.f32 1280  ;;  %vm1153_vm3 = vsmask.f32 3336  ;;  %vm1155_vm4 = vsmask.f32 5392 }
   0xe   : > { %s3117_s22 = smov (!%p255_p6, %s1878_s22), 1  ;;  %vm1157_vm5 = vsmask.f32 7448  ;;  %vm427_vm6 = vcmask 1042432   ;;  %vm428_vm7 = vcmask 1046532   ;;  %vm1154_vm8 = vmor %vm1152_vm2, %vm1153_vm3  ;;  %vm1215_vm15 = vcmask 1040384  }
   0xf   : > { %s2276_s27 = smul.u32 80, %s3117_s22  ;;  %vm2482_vm9 = vmor %vm1154_vm8, %vm1155_vm4  ;;  %vm296_vm10 = vsmask.f32 3328  ;;  %vm297_vm11 = vsmask.f32 7440  ;;  %vm1216_vm2 = vcmask 1042434  }
  0x10   : > { %s2277_s28 = smul.u32 24, %s3117_s22  ;;  %vm2493_vm12 = vmor %vm2482_vm9, %vm1157_vm5  ;;  %vm1218_vm4 = vcmask 1044484   ;;  %vm1220_vm5 = vcmask 1046534   ;;  %v2217_v49 = vld [vmem:[%s3068_s2 + $0x68] sm:$0xff]  ;;  %s2202_s16 = sshll.u32 %s3117_s22, 6 }
  0x11   : > { %s2394_s6 = scalar_lea.vmem %s3066_s0, %s2276_s27  ;;  %vm2520_vm13 = vmor %vm427_vm6, %vm428_vm7  ;;  %s3049_s20 = scalar_lea.vmem %s3070_s4, %s2202_s16 }
  0x12   : > { %s2399_s9 = scalar_lea.vmem %s3067_s1, %s2277_s28  ;;  %v2402_v0 = vld [vmem:[%s2394_s6 + $0x8] sm:$0xf]  ;;  %v2405_v1 = vld [vmem:[%s2394_s6 + $0x10] sm:$0xf]  ;;  %v279_v54 = vld [vmem:[%s2394_s6 + $0xc] sm:$0x1] }
  0x13   : > { %v328_v2 = vshrl.u32 %v2405_v1, 16  ;;  %v331_v3 = vshll.u32 %v2405_v1, 16  ;;  %v3075_v4 = vunpack.c.l.b16 %v2402_v0  ;;  %v3082_v5 = vunpack.c.l.b16 %v2405_v1  ;;  %v1112_v6 = vld [vmem:[%s2399_s9] sm:$0x7]  ;;  %v2413_v7 = vld [vmem:[%s2399_s9 + $0x4] sm:$0x7]  ;;  %vm2561_vm14 = vmor %vm296_vm10, %vm297_vm11 }
  0x14   : > { %v2416_v8 = vld [vmem:[%s2399_s9 + $0x8] sm:$0x7]  ;;  %v2419_v9 = vld [vmem:[%s2399_s9 + $0xc] sm:$0x7]  ;;  %v1122_v10 = vrot.slane %v1112_v6, 2  ;;  %v1123_v11 = vrot.slane %v2413_v7, 2  ;;  %vm1217_vm3 = vmor %vm1215_vm15, %vm1216_vm2 }
  0x15   : > { %v2422_v12 = vrot.slane %v328_v2, 4  ;;  %v2424_v13 = vrot.slane %v331_v3, 5  ;;  %v580_v14 = vpack.c.b16 %v3082_v5, %v3075_v4  ;;  %v1124_v15 = vrot.slane %v2416_v8, 2  ;;  %1290 = vst [vmem:[#allocation1] ss:$4 sm:$0xff] %v1112_v6  ;;  %vm1219_vm6 = vmor %vm1217_vm3, %vm1218_vm4  ;;  %s2203_s21 = sshll.u32 %s3117_s22, 4 }
  0x16   : > { %v1125_v16 = vrot.slane %v2419_v9, 2  ;;  %v2433_v17 = vsel %vm1126_vm0, %v1112_v6, %v1122_v10  ;;  %v2436_v18 = vsel %vm1130_vm1, %v1112_v6, %v1122_v10  ;;  %v2440_v19 = vsel %vm1126_vm0, %v2413_v7, %v1123_v11  ;;  %1292 = vst [vmem:[#allocation1 + $0x1] ss:$4 sm:$0xff] %v2413_v7  ;;  %v2505_v2 = vld [vmem:[%s2394_s6 + $0x14] sm:$0x1]  ;;  %vm2756_vm7 = vmor %vm1219_vm6, %vm1220_vm5  ;;  %s274_s25 = scalar_lea.vmem %s3071_s5, %s2203_s21 }
  0x17   : > { %v1133_v20 = vrot.slane %v2436_v18, 2  ;;  %v2446_v21 = vsel %vm1130_vm1, %v2413_v7, %v1123_v11  ;;  %v2450_v22 = vsel %vm1126_vm0, %v2416_v8, %v1124_v15  ;;  %v2454_v23 = vsel %vm1130_vm1, %v2416_v8, %v1124_v15  ;;  %1294 = vst [vmem:[#allocation1 + $0x2] ss:$4 sm:$0xff] %v2416_v8  ;;  %584 = vrot.lane.b32.xlu0 %v580_v14, %s2345_s10  ;;  %v2511_v14 = vld [vmem:[%s2394_s6] sm:$0xf] }
  0x18   : > { %v3086_v24 = vrot.slane %v2446_v21, 2  ;;  %v3085_v25 = vrot.slane %v2454_v23, 2  ;;  %v2462_v26 = vsel %vm1126_vm0, %v2419_v9, %v1125_v16  ;;  %v2466_v27 = vsel %vm1130_vm1, %v2419_v9, %v1125_v16  ;;  %1296 = vst [vmem:[#allocation1 + $0x3] ss:$4 sm:$0xff] %v2419_v9 }
  0x19   : > { %v3084_v28 = vrot.slane %v2466_v27, 2  ;;  %v1159_v29 = vshrl.u32 %v2433_v17, 16  ;;  %v1162_v30 = vshll.u32 %v2433_v17, 16  ;;  %v1168_v31 = vshll.u32 %v1133_v20, 16 }
  0x1a   : > { %v1172_v32 = vshrl.u32 %v2440_v19, 16  ;;  %v1175_v33 = vshll.u32 %v2440_v19, 16  ;;  %v1181_v34 = vshll.u32 %v3086_v24, 16  ;;  %v1185_v35 = vshrl.u32 %v2450_v22, 16  ;;  %v293_v24 = vld [vmem:[%s2394_s6 + $0x44] sm:$0x1] }
  0x1b   : > { %v1161_v37 = vrot.slane %v1159_v29, 6  ;;  %v1164_v38 = vrot.slane %v1162_v30, 7  ;;  %v1170_v39 = vrot.slane %v1168_v31, 7  ;;  %v1188_v40 = vshll.u32 %v2450_v22, 16 }
  0x1c   : > { %v1174_v41 = vrot.slane %v1172_v32, 6  ;;  %v1177_v42 = vrot.slane %v1175_v33, 7  ;;  %v1183_v43 = vrot.slane %v1181_v34, 7  ;;  %v1187_v44 = vrot.slane %v1185_v35, 6  ;;  %v2526_v32 = vld [vmem:[%s2394_s6 + $0x4] sm:$0x1] }
  0x1d   : > { %v1165_v45 = vor.u32 %v1164_v38, %v1161_v37  ;;  %v1190_v46 = vrot.slane %v1188_v40, 7  ;;  %v1194_v47 = vshll.u32 %v3085_v25, 16  ;;  %v1198_v48 = vshrl.u32 %v2462_v26, 16  ;;  %v2535_v37 = vld [vmem:[%s2394_s6 + $0x18] sm:$0xf] }
  0x1e   : > { %v1178_v50 = vor.u32 %v1177_v42, %v1174_v41  ;;  %v1201_v51 = vshll.u32 %v2462_v26, 16  ;;  %v1207_v52 = vshll.u32 %v3084_v28, 16  ;;  %v314_v53 = vshrl.u32 %v2402_v0, 16 }
  0x1f   : > { %v1166_v55 = vrot.slane %v1165_v45, 2  ;;  %v1191_v56 = vor.u32 %v1190_v46, %v1187_v44  ;;  %v1196_v57 = vrot.slane %v1194_v47, 7  ;;  %v1200_v58 = vrot.slane %v1198_v48, 6  ;;  %v2502_v59 = vld.sshfl [vmem:[#allocation1] sm:$0xff pattern:$0x73625140] }
  0x20   : > { %v1179_v60 = vrot.slane %v1178_v50, 2  ;;  %v1203_v61 = vrot.slane %v1201_v51, 7  ;;  %v1209_v62 = vrot.slane %v1207_v52, 7  ;;  %v316_v63 = vrot.slane %v314_v53, 4  ;;  %v2547_v46 = vld [vmem:[%s2394_s6 + $0x20] sm:$0xf] }
  0x21   : > { %v1171_v3 = vsel %vm2493_vm12, %v1166_v55, %v1170_v39  ;;  %v1192_v6 = vrot.slane %v1191_v56, 2  ;;  %v317_v10 = vshll.u32 %v2402_v0, 16  ;;  %v323_v11 = vshll.u32 %v279_v54, 16  ;;  %v283_v47 = vld [vmem:[%s2394_s6 + $0x1c] sm:$0x1] }
  0x22   : > { %v2515_v15 = vsel %vm2493_vm12, %v1179_v60, %v1183_v43  ;;  %v1204_v16 = vor.u32 %v1203_v61, %v1200_v58  ;;  %1299 = vst [vmem:[#allocation1] ss:$4 sm:$0xff] %v1171_v3  ;;  %v337_v29 = vshll.u32 %v2505_v2, 16  ;;  %v1892_v31 = vrot.slane %v2402_v0, 9 }
  0x23   : > { %v2530_v33 = vsel %vm2493_vm12, %v1192_v6, %v1196_v57  ;;  %1302 = vst [vmem:[#allocation1 + $0x1] ss:$4 sm:$0xff] %v2515_v15  ;;  %v319_v34 = vrot.slane %v317_v10, 5  ;;  %v436_v35 = vrot.slane %v279_v54, 5  ;;  %v1893_v36 = vrot.slane %v2405_v1, 9 }
  0x24   : > { %v1205_v38 = vrot.slane %v1204_v16, 2  ;;  %1305 = vst [vmem:[#allocation1 + $0x2] ss:$4 sm:$0xff] %v2530_v33  ;;  %v440_v39 = vrot.slane %v2505_v2, 5  ;;  %v300_v40 = vshrl.u32 %v2511_v14, 16  ;;  %v303_v41 = vshll.u32 %v2511_v14, 16 }
  0x25   : > { %v2543_v42 = vsel %vm2520_vm13, %v1892_v31, %v436_v35  ;;  %v309_v43 = vshll.u32 %v2526_v32, 16  ;;  %v320_v44 = vor.u32 %v319_v34, %v316_v63  ;;  %v325_v45 = vrot.slane %v323_v11, 5  ;;  %v2566_v54 = vld [vmem:[%s2394_s6 + $0x24] sm:$0x1]  ;;  %v2581_v16 = vld [vmem:[%s2394_s6 + $0x28] sm:$0xf] }
  0x26   : > { %v2552_v48 = vsel %vm2493_vm12, %v1205_v38, %v1209_v62  ;;  %v2556_v50 = vsel %vm2520_vm13, %v1893_v36, %v440_v39  ;;  %v3083_v51 = vunpack.c.l.b16 %v2543_v42  ;;  %v302_v53 = vrot.slane %v300_v40, 4  ;;  %v2584_v31 = vld [vmem:[%s2394_s6 + $0x30] sm:$0xf] }
  0x27   : > { %1308 = vst [vmem:[#allocation1 + $0x3] ss:$4 sm:$0xff] %v2552_v48  ;;  %v3076_v55 = vunpack.c.l.b16 %v2556_v50  ;;  %v305_v56 = vrot.slane %v303_v41, 5  ;;  %v311_v57 = vrot.slane %v309_v43, 5  ;;  %v321_v58 = vrot.slane %v320_v44, 4 }
  0x28   : > { %v3079_v60 = vunpack.c.l.b16 %v2535_v37  ;;  %v3072_v61 = vunpack.c.l.b16 %v2547_v46  ;;  %v1894_v62 = vrot.slane %v2535_v37, 9  ;;  %v444_v63 = vrot.slane %v283_v47, 5 }
  0x29   : > { %v784_v3 = vpack.c.b16 %v3076_v55, %v3083_v51  ;;  %v306_v6 = vor.u32 %v305_v56, %v302_v53  ;;  %v326_v10 = vsel %vm2561_vm14, %v321_v58, %v325_v45  ;;  %v1895_v11 = vrot.slane %v2547_v46, 9  ;;  %v289_v55 = vld [vmem:[%s2394_s6 + $0x34] sm:$0x1] }
  0x2a   : > { %v2586_v34 = vunpack.c.l.b16 %v326_v10  ;;  %v581_v35 = vpack.c.b16 %v3072_v61, %v3079_v60  ;;  %v2594_v36 = vsel %vm2520_vm13, %v1894_v62, %v444_v63  ;;  %v448_v38 = vrot.slane %v2566_v54, 5  ;;  %v2623_v61 = vld [vmem:[%s2394_s6 + $0x40] sm:$0xf] }
  0x2b   : > { %788 = vrot.lane.b32.xlu1 %v784_v3, %s2345_s10  ;;  %v307_v39 = vrot.slane %v306_v6, 4  ;;  %v3078_v40 = vunpack.c.l.b16 %v2594_v36  ;;  %v384_v41 = vshrl.u32 %v2584_v31, 16  ;;  %v387_v43 = vshll.u32 %v2584_v31, 16 }
  0x2c   : > { %586 = vrot.lane.b32.xlu0 %v581_v35, %s2345_s10  ;;  %v2604_v44 = vsel %vm2520_vm13, %v1895_v11, %v448_v38  ;;  %v3074_v45 = vunpack.c.l.b16 %v2581_v16  ;;  %v3073_v53 = vunpack.c.l.b16 %v2584_v31  ;;  %v370_v56 = vshrl.u32 %v2581_v16, 16  ;;  %v2620_v38 = vld [vmem:[%s2394_s6 + $0x38] sm:$0xf] }
  0x2d   : > { %v312_v58 = vsel %vm2561_vm14, %v307_v39, %v311_v57  ;;  %v3077_v62 = vunpack.c.l.b16 %v2604_v44  ;;  %v386_v63 = vrot.slane %v384_v41, 4  ;;  %v389_v3 = vrot.slane %v387_v43, 5 }
  0x2e   : > { %v514_v6 = vunpack.c.l.b16 %v312_v58  ;;  %v582_v10 = vpack.c.b16 %v3073_v53, %v3074_v45  ;;  %v2616_v11 = vrot.slane %v370_v56, 4  ;;  %v373_v35 = vshll.u32 %v2581_v16, 16  ;;  %v2635_v56 = vld [vmem:[%s2394_s6 + $0x2c] sm:$0x1] }
  0x2f   : > { %v785_v57 = vpack.c.b16 %v3077_v62, %v3078_v40  ;;  %v334_v39 = vor.u32 %v2424_v13, %v2422_v12  ;;  %v339_v41 = vrot.slane %v337_v29, 5  ;;  %v342_v43 = vshrl.u32 %v2535_v37, 16 }
  0x30   : > { %v522_v58 = vpack.c.b16 %v2586_v34, %v514_v6  ;;  %588 = vrot.lane.b32.xlu2 %v582_v10, %s2345_s10  ;;  %v375_v53 = vrot.slane %v373_v35, 5  ;;  %v345_v45 = vshll.u32 %v2535_v37, 16  ;;  %v351_v4 = vshll.u32 %v283_v47, 16 }
  0x31   : > { %v335_v62 = vrot.slane %v334_v39, 4  ;;  %v344_v40 = vrot.slane %v342_v43, 4  ;;  %v3081_v12 = vunpack.c.l.b16 %v2620_v38  ;;  %v3080_v13 = vunpack.c.l.b16 %v2623_v61 }
  0x32   : > { %v347_v2 = vrot.slane %v345_v45, 5  ;;  %v353_v29 = vrot.slane %v351_v4, 5  ;;  %v1896_v60 = vrot.slane %v2581_v16, 9  ;;  %v452_v6 = vrot.slane %v2635_v56, 5 }
  0x33   : > { %526 = vrot.lane.b32.xlu1 %v522_v58, %s2345_s10  ;;  %v340_v10 = vsel %vm2561_vm14, %v335_v62, %v339_v41  ;;  %v583_v47 = vpack.c.b16 %v3080_v13, %v3081_v12  ;;  %v1897_v35 = vrot.slane %v2584_v31, 9  ;;  %v456_v39 = vrot.slane %v289_v55, 5  ;;  %v2661_v58 = vld [vmem:[%s2394_s6 + $0x3c] sm:$0x1] }
  0x34   : > { %790 = vrot.lane.b32.xlu0 %v785_v57, %s2345_s10  ;;  %v348_v4 = vor.u32 %v347_v2, %v344_v40  ;;  %v2654_v45 = vunpack.c.l.b16 %v340_v10  ;;  %v2658_v43 = vsel %vm2520_vm13, %v1896_v60, %v452_v6  ;;  %v390_v62 = vor.u32 %v389_v3, %v386_v63 }
  0x35   : > { %v2665_v41 = vsel %vm2520_vm13, %v1897_v35, %v456_v39  ;;  %v3088_v13 = vunpack.c.l.b16 %v2658_v43  ;;  %v393_v12 = vshll.u32 %v289_v55, 16  ;;  %v398_v5 = vshrl.u32 %v2620_v38, 16 }
  0x36   : > { %v349_v57 = vrot.slane %v348_v4, 4  ;;  %v3087_v40 = vunpack.c.l.b16 %v2665_v41  ;;  %v391_v2 = vrot.slane %v390_v62, 4  ;;  %v401_v10 = vshll.u32 %v2620_v38, 16 }
  0x37   : > { %v395_v60 = vrot.slane %v393_v12, 5  ;;  %v400_v6 = vrot.slane %v398_v5, 4  ;;  %v407_v63 = vshll.u32 %v2661_v58, 16  ;;  %v356_v3 = vshrl.u32 %v2547_v46, 16 }
  0x38   : > { %v354_v35 = vsel %vm2561_vm14, %v349_v57, %v353_v29  ;;  %v786_v55 = vpack.c.b16 %v3087_v40, %v3088_v13  ;;  %v403_v39 = vrot.slane %v401_v10, 5  ;;  %v359_v4 = vshll.u32 %v2547_v46, 16 }
  0x39   : > { %v2680_v62 = vunpack.c.l.b16 %v354_v35  ;;  %v396_v5 = vsel %vm2561_vm14, %v391_v2, %v395_v60  ;;  %v409_v12 = vrot.slane %v407_v63, 5  ;;  %v358_v51 = vrot.slane %v356_v3, 4  ;;  %v2694_v2 = vld [vmem:[%s2394_s6 + $0x48] sm:$0xf] }
  0x3a   : > { %v404_v28 = vor.u32 %v403_v39, %v400_v6  ;;  %v2684_v25 = vunpack.c.l.b16 %v396_v5  ;;  %v361_v29 = vrot.slane %v359_v4, 5  ;;  %v365_v57 = vshll.u32 %v2566_v54, 16  ;;  %v2703_v5 = vld [vmem:[%s2394_s6 + $0x4c] sm:$0x1] }
  0x3b   : > { %v523_v40 = vpack.c.b16 %v2680_v62, %v2654_v45  ;;  %590 = vrot.lane.b32.xlu1 %v583_v47, %s2345_s10  ;;  %v376_v10 = vor.u32 %v375_v53, %v2616_v11  ;;  %v379_v35 = vshll.u32 %v2635_v56, 16  ;;  %v463_v60 = vshrl.u32 %v2623_v61, 16 }
  0x3c   : > { %792 = vrot.lane.b32.xlu0 %v786_v55, %s2345_s10  ;;  %v405_v6 = vrot.slane %v404_v28, 4  ;;  %v362_v63 = vor.u32 %v361_v29, %v358_v51  ;;  %v367_v54 = vrot.slane %v365_v57, 5  ;;  %v466_v3 = vshll.u32 %v2623_v61, 16 }
  0x3d   : > { %528 = vrot.lane.b32.xlu2 %v523_v40, %s2345_s10  ;;  %v377_v39 = vrot.slane %v376_v10, 4  ;;  %v381_v47 = vrot.slane %v379_v35, 5  ;;  %v465_v4 = vrot.slane %v463_v60, 4  ;;  %v472_v53 = vshll.u32 %v293_v24, 16 }
  0x3e   : > { %v410_v11 = vsel %vm2561_vm14, %v405_v6, %v409_v12  ;;  %v363_v56 = vrot.slane %v362_v63, 4  ;;  %v468_v13 = vrot.slane %v466_v3, 5  ;;  %v483_v55 = vshrl.u32 %v2694_v2, 16 }
  0x3f   : > { %v2706_v28 = vunpack.c.l.b16 %v410_v11  ;;  %v382_v51 = vsel %vm2561_vm14, %v377_v39, %v381_v47  ;;  %v474_v29 = vrot.slane %v472_v53, 5  ;;  %v486_v40 = vshll.u32 %v2694_v2, 16 }
  0x40   : > { %v368_v57 = vsel %vm2561_vm14, %v363_v56, %v367_v54  ;;  %v2713_v10 = vunpack.c.l.b16 %v382_v51  ;;  %v469_v12 = vor.u32 %v468_v13, %v465_v4  ;;  %v485_v35 = vrot.slane %v483_v55, 4 }
  0x41   : > { %v525_v60 = vpack.c.b16 %v2706_v28, %v2684_v25  ;;  %v2717_v6 = vunpack.c.l.b16 %v368_v57  ;;  %v488_v63 = vrot.slane %v486_v40, 5  ;;  %v492_v3 = vshll.u32 %v2703_v5, 16 }
  0x42   : > { %v470_v11 = vrot.slane %v469_v12, 4  ;;  %v1898_v39 = vrot.slane %v2620_v38, 9  ;;  %v460_v47 = vrot.slane %v2661_v58, 5  ;;  %v1899_v53 = vrot.slane %v2623_v61, 9  ;;  %v2742_v12 = vld [vmem:[%s2399_s9 + $0x10] sm:$0x7] }
  0x43   : > { %532 = vrot.lane.b32.xlu1 %v525_v60, %s2345_s10  ;;  %v524_v13 = vpack.c.b16 %v2713_v10, %v2717_v6  ;;  %v489_v54 = vor.u32 %v488_v63, %v485_v35  ;;  %v494_v4 = vrot.slane %v492_v3, 5  ;;  %v480_v56 = vrot.slane %v293_v24, 5  ;;  %v1309_v60 = vld.sshfl [vmem:[#allocation1] sm:$0xff pattern:$0x73625140] }
  0x44   : > { %v475_v55 = vsel %vm2561_vm14, %v470_v11, %v474_v29  ;;  %v2730_v51 = vsel %vm2520_vm13, %v1898_v39, %v460_v47  ;;  %v2049_v35 = vrot.slane %v2433_v17, 9  ;;  %v1224_v3 = vrot.slane %v1133_v20, 7  ;;  %v2227_v17 = vld [vmem:[%s3068_s2 + $0xb8] sm:$0xff] }
  0x45   : > { %530 = vrot.lane.b32.xlu2 %v524_v13, %s2345_s10  ;;  %v490_v58 = vrot.slane %v489_v54, 4  ;;  %v2733_v40 = vunpack.c.l.b16 %v475_v55  ;;  %v2737_v57 = vsel %vm2520_vm13, %v1899_v53, %v480_v56  ;;  %v574_v24 = vunpack.c.l.b16 %v2730_v51  ;;  %876 = vmatpush.bf16.msra.mxu2 %v2227_v17  ;;  %v2207_v17 = vld [vmem:[%s3068_s2 + $0x18] sm:$0xff]  ;;  %v2269_v51 = vld [vmem:[#allocation2 + $0xe8] sm:$0xff] }
  0x46   : > { %v783_v29 = vunpack.c.l.b16 %v2737_v57  ;;  %v2050_v11 = vrot.slane %v2440_v19, 9  ;;  %v3097_v39 = vrot.slane %v2446_v21, 2  ;;  %v2051_v52 = vrot.slane %v2450_v22, 9 }
  0x47   : > { %v495_v63 = vsel %vm2561_vm14, %v490_v58, %v494_v4  ;;  %v3100_v18 = vrot.slane %v2454_v23, 2  ;;  %v1225_v19 = vsel %vm2756_vm7, %v2049_v35, %v1224_v3  ;;  %v2052_v54 = vrot.slane %v2462_v26, 9 }
  0x48   : > { %v1228_v47 = vrot.slane %v3097_v39, 7  ;;  %v915_v53 = vunpack.c.l.b16 %v495_v63  ;;  %v787_v13 = vpack.c.b16 %v783_v29, %v574_v24  ;;  %v3101_v4 = vrot.slane %v2466_v27, 2  ;;  %1333 = vst [vmem:[#allocation1] ss:$4 sm:$0xff] %v1225_v19 }
  0x49   : > { %v1232_v20 = vrot.slane %v3100_v18, 7  ;;  %v1239_v22 = vrot.slane %v2742_v12, 2 }
  0x4a   : > { %v1229_v21 = vsel %vm2756_vm7, %v2050_v11, %v1228_v47  ;;  %v1236_v56 = vrot.slane %v3101_v4, 7  ;;  %v916_v55 = vpack.c.b16 %v915_v53, %v2733_v40 }
  0x4b   : > { %v2773_v58 = vsel %vm2756_vm7, %v2051_v52, %v1232_v20  ;;  %1311 = vrot.lane.b32.xlu1 %v1309_v60, %s2345_s10  ;;  %1336 = vst [vmem:[#allocation1 + $0x1] ss:$4 sm:$0xff] %v1229_v21  ;;  %v1242_v26 = vsel %vm1126_vm0, %v2742_v12, %v1239_v22  ;;  %v1243_v27 = vsel %vm1130_vm1, %v2742_v12, %v1239_v22 }
  0x4c   : > { %v2779_v23 = vsel %vm2756_vm7, %v2052_v54, %v1236_v56  ;;  %917 = vrot.lane.b32.xlu0 %v916_v55, %s2345_s10  ;;  %1339 = vst [vmem:[#allocation1 + $0x2] ss:$4 sm:$0xff] %v2773_v58  ;;  %v1245_v35 = vrot.slane %v1243_v27, 2  ;;  %v1246_v60 = vshrl.u32 %v1242_v26, 16  ;;  %v1249_v63 = vshll.u32 %v1242_v26, 16  ;;  %v2219_v27 = vld [vmem:[%s3068_s2 + $0x78] sm:$0xff] }
  0x4d   : > { %794 = vrot.lane.b32.xlu2 %v787_v13, %s2345_s10  ;;  %v2053_v3 = vrot.slane %v1242_v26, 9  ;;  %1342 = vst [vmem:[#allocation1 + $0x3] ss:$4 sm:$0xff] %v2779_v23  ;;  %v2794_v54 = vld [vmem:[%s2399_s9 + $0x14] sm:$0x7]  ;;  %672 = vmatpush.bf16.msra.mxu0 %v2219_v27  ;;  %v2216_v27 = vld [vmem:[%s3068_s2 + $0x60] sm:$0xff] }
  0x4e   : > { %v1248_v11 = vrot.slane %v1246_v60, 6  ;;  %v1251_v39 = vrot.slane %v1249_v63, 7  ;;  %v1255_v47 = vshll.u32 %v1245_v35, 16  ;;  %v1262_v53 = vrot.slane %v1245_v35, 7 }
  0x4f   : > { %v1265_v4 = vrot.slane %v2794_v54, 2 }
  0x50   : > { %v1252_v52 = vor.u32 %v1251_v39, %v1248_v11  ;;  %v1257_v18 = vrot.slane %v1255_v47, 7  ;;  %v2791_v20 = vsel %vm2756_vm7, %v2053_v3, %v1262_v53  ;;  %v2218_v11 = vld [vmem:[%s3068_s2 + $0x70] sm:$0xff] }
  0x51   : > { %v1268_v55 = vsel %vm1126_vm0, %v2794_v54, %v1265_v4  ;;  %v1269_v35 = vsel %vm1130_vm1, %v2794_v54, %v1265_v4  ;;  %673 = vmatpush.bf16.msra.mxu0 %v2218_v11  ;;  %vm534_vm0 = vcmask 523264  }
  0x52   : > { %v1253_v19 = vrot.slane %v1252_v52, 2  ;;  %v1272_v22 = vshrl.u32 %v1268_v55, 16  ;;  %v1275_v26 = vshll.u32 %v1268_v55, 16  ;;  %v1271_v60 = vrot.slane %v1269_v35, 2  ;;  %v2234_v35 = vld [vmem:[%s3068_s2 + $0xf0] sm:$0xff] }
  0x53   : > { %v2054_v3 = vrot.slane %v1268_v55, 9 }
  0x54   : > { %v2796_v13 = vld.sshfl [vmem:[#allocation1] sm:$0xff pattern:$0x73625140]  ;;  %v2801_v56 = vsel %vm2493_vm12, %v1253_v19, %v1257_v18  ;;  %v1277_v63 = vrot.slane %v1275_v26, 7  ;;  %v1281_v47 = vshll.u32 %v1271_v60, 16  ;;  %v1288_v53 = vrot.slane %v1271_v60, 7 }
  0x55   : > { %1344 = vst [vmem:[#allocation1] ss:$4 sm:$0xff] %v2413_v7  ;;  %v1274_v7 = vrot.slane %v1272_v22, 6  ;;  %674 = vmatpush.bf16.msra.mxu0 %v2217_v49  ;;  %v2226_v26 = vld [vmem:[%s3068_s2 + $0xb0] sm:$0xff] }
  0x56   : > { %1346 = vst [vmem:[#allocation1 + $0x1] ss:$4 sm:$0xff] %v2416_v8  ;;  %v1283_v18 = vrot.slane %v1281_v47, 7  ;;  %v2819_v19 = vsel %vm2756_vm7, %v2054_v3, %v1288_v53  ;;  %877 = vmatpush.bf16.msra.mxu2 %v2226_v26  ;;  %v2210_v60 = vld [vmem:[%s3068_s2 + $0x30] sm:$0xff]  ;;  %v2233_v3 = vld [vmem:[%s3068_s2 + $0xe8] sm:$0xff]  ;;  %v2224_v47 = vld [vmem:[%s3068_s2 + $0xa0] sm:$0xff] }
  0x57   : > { %1348 = vst [vmem:[#allocation1 + $0x2] ss:$4 sm:$0xff] %v2419_v9  ;;  %v1278_v39 = vor.u32 %v1277_v63, %v1274_v7  ;;  %v2225_v7 = vld [vmem:[%s3068_s2 + $0xa8] sm:$0xff]  ;;  %v2215_v63 = vld [vmem:[%s3068_s2 + $0x58] sm:$0xff]  ;;  %v2214_v53 = vld [vmem:[%s3068_s2 + $0x50] sm:$0xff] }
  0x58   : > { %1350 = vst [vmem:[#allocation1 + $0x3] ss:$4 sm:$0xff] %v2742_v12  ;;  %v2222_v49 = vld [vmem:[%s3068_s2 + $0x90] sm:$0xff]  ;;  %v2239_v26 = vld [vmem:[%s3068_s2 + $0x118] sm:$0xff] }
  0x59   : > { %v1279_v52 = vrot.slane %v1278_v39, 2  ;;  %675 = vmatpush.bf16.msra.mxu0 %v2216_v27  ;;  %v2209_v39 = vld [vmem:[%s3068_s2 + $0x28] sm:$0xff] }
  0x5a   : > { %878 = vmatpush.bf16.msra.mxu2 %v2225_v7 }
  0x5b   : > { %v2823_v22 = vsel %vm2493_vm12, %v1279_v52, %v1283_v18  ;;  %v2232_v52 = vld [vmem:[%s3068_s2 + $0xe0] sm:$0xff]  ;;  %v2223_v18 = vld [vmem:[%s3068_s2 + $0x98] sm:$0xff] }
  0x5d   : > { %676 = vmatpush.bf16.msra.mxu0 %v2215_v63  ;;  %v2205_v63 = vld [vmem:[%s3068_s2 + $0x8] sm:$0xff] }
  0x5e   : > { %879 = vmatpush.bf16.msra.mxu2 %v2224_v47  ;;  %v2204_v47 = vld [vmem:[%s3068_s2] sm:$0xff] }
  0x5f   : > { %v1351_v4 = vld.sshfl [vmem:[#allocation1] sm:$0xff pattern:$0x73625140] }
  0x60   : > { %1498 = vst [vmem:[#allocation1] ss:$4 sm:$0xff] %v2515_v15  ;;  %1353 = vrot.lane.b32.xlu2 %v1351_v4, %s2345_s10  ;;  %v2235_v15 = vld [vmem:[%s3068_s2 + $0xf8] sm:$0xff]  ;;  %v432_v4 = vrot.slane %v2526_v32, 5  ;;  %v2230_v32 = vld [vmem:[%s3068_s2 + $0xd0] sm:$0xff] }
  0x61   : > { %1500 = vst [vmem:[#allocation1 + $0x1] ss:$4 sm:$0xff] %v2530_v33  ;;  %987 = vmatpush.bf16.msra.mxu3 %v2235_v15  ;;  %677 = vmatpush.bf16.msra.mxu0 %v2214_v53  ;;  %v2212_v15 = vld [vmem:[%s3068_s2 + $0x40] sm:$0xff] }
  0x62   : > { %1502 = vst [vmem:[#allocation1 + $0x2] ss:$4 sm:$0xff] %v2552_v48  ;;  %880 = vmatpush.bf16.msra.mxu2 %v2223_v18  ;;  %v3103_v18 = vunpack.c.l.b16 %v2405_v1  ;;  %v3105_v1 = vunpack.c.l.b16 %v2556_v50  ;;  %v3107_v50 = vunpack.c.l.b16 %v2402_v0  ;;  %v2236_v0 = vld [vmem:[%s3068_s2 + $0x100] sm:$0xff] }
  0x63   : > { %1505 = vst [vmem:[#allocation1 + $0x3] ss:$4 sm:$0xff] %v2801_v56 }
  0x65   : > { %988 = vmatpush.bf16.msra.mxu3 %v2234_v35  ;;  %v2206_v35 = vld [vmem:[%s3068_s2 + $0x10] sm:$0xff] }
  0x66   : > { %881 = vmatpush.bf16.msra.mxu2 %v2222_v49  ;;  %v2263_v49 = vld [vmem:[#allocation2 + $0xb8] sm:$0xff] }
  0x69   : > { %989 = vmatpush.bf16.msra.mxu3 %v2233_v3 }
  0x6a   : > { %v2830_v55 = vld.sshfl [vmem:[#allocation1] sm:$0xff pattern:$0x73625140] }
  0x6b   : > { %1507 = vst [vmem:[#allocation1] ss:$4 sm:$0xff] %v1229_v21  ;;  %v2211_v21 = vld [vmem:[%s3068_s2 + $0x38] sm:$0xff] }
  0x6c   : > { %1509 = vst [vmem:[#allocation1 + $0x1] ss:$4 sm:$0xff] %v2773_v58  ;;  %749 = vmatpush.bf16.msra.mxu1 %v2211_v21 }
  0x6d   : > { %1511 = vst [vmem:[#allocation1 + $0x2] ss:$4 sm:$0xff] %v2779_v23  ;;  %990 = vmatpush.bf16.msra.mxu3 %v2232_v52 }
  0x6e   : > { %1514 = vst [vmem:[#allocation1 + $0x3] ss:$4 sm:$0xff] %v2791_v20 }
  0x70   : > { %750 = vmatpush.bf16.msra.mxu1 %v2210_v60  ;;  %v2221_v60 = vld [vmem:[%s3068_s2 + $0x88] sm:$0xff] }
  0x71   : > { %882 = vmatpush.bf16.msra.mxu2 %v2221_v60  ;;  %v2245_v60 = vld [vmem:[#allocation2 + $0x28] sm:$0xff] }
  0x74   : > { %751 = vmatpush.bf16.msra.mxu1 %v2209_v39 }
  0x75   : > { %v1515_v11 = vld.sshfl [vmem:[#allocation1] sm:$0xff pattern:$0x73625140] }
  0x76   : > { %1517 = vrot.lane.b32.xlu0 %v1515_v11, %s2345_s10  ;;  %1602 = vst [vmem:[#allocation1] ss:$4 sm:$0xff] %v2416_v8  ;;  %v2208_v8 = vld [vmem:[%s3068_s2 + $0x20] sm:$0xff] }
  0x77   : > { %1604 = vst [vmem:[#allocation1 + $0x1] ss:$4 sm:$0xff] %v2419_v9  ;;  %v2213_v9 = vld [vmem:[%s3068_s2 + $0x48] sm:$0xff]  ;;  %v2228_v11 = vld [vmem:[%s3068_s2 + $0xc0] sm:$0xff] }
  0x78   : > { %1606 = vst [vmem:[#allocation1 + $0x2] ss:$4 sm:$0xff] %v2742_v12  ;;  %v2231_v12 = vld [vmem:[%s3068_s2 + $0xd8] sm:$0xff]  ;;  %752 = vmatpush.bf16.msra.mxu1 %v2208_v8  ;;  %678 = vmatpush.bf16.msra.mxu0 %v2213_v9  ;;  %v2247_v8 = vld [vmem:[#allocation2 + $0x38] sm:$0xff]  ;;  %v3104_v9 = vunpack.c.l.b16 %v2535_v37  ;;  %v3106_v37 = vunpack.c.l.b16 %v2594_v36 }
  0x79   : > { %1608 = vst [vmem:[#allocation1 + $0x3] ss:$4 sm:$0xff] %v2794_v54  ;;  %v1891_v54 = vrot.slane %v2511_v14, 9  ;;  %991 = vmatpush.bf16.msra.mxu3 %v2231_v12 }
  0x7a   : > { %v511_v12 = vpack.c.b16 %v3104_v9, %v3103_v18  ;;  %v2250_v9 = vld [vmem:[#allocation2 + $0x50] sm:$0xff] }
  0x7b   : > { %v433_v21 = vsel %vm2520_vm13, %v1891_v54, %v432_v4  ;;  %v2255_v4 = vld [vmem:[#allocation2 + $0x78] sm:$0xff] }
  0x7c   : > { %753 = vmatpush.bf16.msra.mxu1 %v2207_v17  ;;  %679 = vmatpush.bf16.msra.mxu0 %v2212_v15  ;;  %v567_v7 = vunpack.c.l.b16 %v433_v21  ;;  %v2968_v15 = vpack.c.b16 %v3106_v37, %v3105_v1  ;;  %v2271_v1 = vld [vmem:[#allocation2 + $0xf8] sm:$0xff]  ;;  %v2260_v37 = vld [vmem:[#allocation2 + $0xa0] sm:$0xff] }
  0x7d   : > { %992 = vmatpush.bf16.msra.mxu3 %v2230_v32 }
  0x80   : > { %v2916_v27 = vld.sshfl [vmem:[#allocation1] sm:$0xff pattern:$0x73625140]  ;;  %1071 = vmatpush.bf16.msrb.mxu0 %v2239_v26  ;;  %754 = vmatpush.bf16.msra.mxu1 %v2206_v35  ;;  %v502_v26 = vunpack.c.l.b16 %v2511_v14 }
  0x81   : > { %1610 = vst [vmem:[#allocation1] ss:$4 sm:$0xff] %v2530_v33  ;;  %v2229_v33 = vld [vmem:[%s3068_s2 + $0xc8] sm:$0xff] }
  0x82   : > { %1612 = vst [vmem:[#allocation1 + $0x1] ss:$4 sm:$0xff] %v2552_v48  ;;  %v2220_v48 = vld [vmem:[%s3068_s2 + $0x80] sm:$0xff]  ;;  %993 = vmatpush.bf16.msra.mxu3 %v2229_v33  ;;  %v510_v36 = vpack.c.b16 %v3107_v50, %v502_v26  ;;  %v3109_v33 = vunpack.c.l.b16 %v2581_v16  ;;  %v2268_v50 = vld [vmem:[#allocation2 + $0xe0] sm:$0xff] }
  0x83   : > { %1614 = vst [vmem:[#allocation1 + $0x2] ss:$4 sm:$0xff] %v2801_v56  ;;  %v3102_v56 = vunpack.c.l.b16 %v2543_v42  ;;  %883 = vmatpush.bf16.msra.mxu2 %v2220_v48  ;;  %v2259_v26 = vld [vmem:[#allocation2 + $0x98] sm:$0xff] }
  0x84   : > { %1617 = vst [vmem:[#allocation1 + $0x3] ss:$4 sm:$0xff] %v2823_v22  ;;  %v2238_v22 = vld [vmem:[%s3068_s2 + $0x110] sm:$0xff]  ;;  %755 = vmatpush.bf16.msra.mxu1 %v2205_v63 }
  0x85   : > { %v575_v3 = vpack.c.b16 %v3102_v56, %v567_v7  ;;  %1072 = vmatpush.bf16.msrb.mxu0 %v2238_v22  ;;  %v3108_v7 = vunpack.c.l.b16 %v2547_v46  ;;  %v2262_v22 = vld [vmem:[#allocation2 + $0xb0] sm:$0xff]  ;;  %v2244_v46 = vld [vmem:[#allocation2 + $0x20] sm:$0xff] }
  0x86   : > { %994 = vmatpush.bf16.msra.mxu3 %v2228_v11  ;;  %v2252_v11 = vld [vmem:[#allocation2 + $0x60] sm:$0xff] }
  0x87   : > { %1484 = vmatpush.bf16.msrb.mxu2 %v2247_v8  ;;  %v512_v63 = vpack.c.b16 %v3109_v33, %v3108_v7  ;;  %v3111_v8 = vunpack.c.l.b16 %v2658_v43  ;;  %v3113_v43 = vunpack.c.l.b16 %v2620_v38  ;;  %v2241_v38 = vld [vmem:[#allocation2 + $0x8] sm:$0xff] }
  0x88   : > { %756 = vmatpush.bf16.msra.mxu1 %v2204_v47  ;;  %v2251_v47 = vld [vmem:[#allocation2 + $0x58] sm:$0xff]  ;;  %v2257_v33 = vld [vmem:[#allocation2 + $0x88] sm:$0xff] }
  0x89   : > { %v585_v39 = vpop.permute.xlu0 %584 }
  0x8a   : > { %v594_v42 = vsel %vm534_vm0, %v575_v3, %v585_v39  ;;  %v589_v52 = vpop.permute.xlu2 %588  ;;  %1586 = vmatpush.bf16.msrb.mxu3 %v2263_v49  ;;  %v780_v39 = vpack.c.b16 %v2717_v6, %v2680_v62 }
  0x8b   : > { %v1618_v53 = vld.sshfl [vmem:[#allocation1] sm:$0xff pattern:$0x73625140]  ;;  %680 = vmatmul.bf16.vlgmr.msra.gmra.mxu0 %v594_v42  ;;  %v2261_v42 = vld [vmem:[#allocation2 + $0xa8] sm:$0xff] }
  0x8c   : > { %1713 = vst [vmem:[#allocation1] ss:$4 sm:$0xff] %v2773_v58  ;;  %1620 = vrot.lane.b32.xlu1 %v1618_v53, %s2345_s10  ;;  %v2237_v58 = vld [vmem:[%s3068_s2 + $0x108] sm:$0xff]  ;;  %1422 = vmatpush.bf16.msrb.mxu1 %v2255_v4  ;;  %v3110_v53 = vunpack.c.l.b16 %v2604_v44  ;;  %v2249_v4 = vld [vmem:[#allocation2 + $0x48] sm:$0xff]  ;;  %v3112_v44 = vunpack.c.l.b16 %v2584_v31 }
  0x8d   : > { %1715 = vst [vmem:[#allocation1 + $0x1] ss:$4 sm:$0xff] %v2779_v23  ;;  %v2246_v23 = vld [vmem:[#allocation2 + $0x30] sm:$0xff]  ;;  %1073 = vmatpush.bf16.msrb.mxu0 %v2237_v58 }
  0x8e   : > { %1717 = vst [vmem:[#allocation1 + $0x2] ss:$4 sm:$0xff] %v2791_v20  ;;  %v2254_v20 = vld [vmem:[#allocation2 + $0x70] sm:$0xff]  ;;  %1485 = vmatpush.bf16.msrb.mxu2 %v2246_v23  ;;  %1587 = vmatpush.bf16.msrb.mxu3 %v2262_v22  ;;  %v2994_v18 = vpack.c.b16 %v3111_v8, %v3110_v53  ;;  %v513_v58 = vpack.c.b16 %v3113_v43, %v3112_v44  ;;  %v500_v8 = vrot.slane %v2703_v5, 5 }
  0x8f   : > { %1720 = vst [vmem:[#allocation1 + $0x3] ss:$4 sm:$0xff] %v2819_v19  ;;  %v779_v19 = vpack.c.b16 %v2654_v45, %v2586_v34  ;;  %v2253_v45 = vld [vmem:[#allocation2 + $0x68] sm:$0xff]  ;;  %v2266_v22 = vld [vmem:[#allocation2 + $0xd0] sm:$0xff] }
  0x90   : > { %1423 = vmatpush.bf16.msrb.mxu1 %v2254_v20  ;;  %v2248_v20 = vld [vmem:[#allocation2 + $0x40] sm:$0xff] }
  0x91   : > { %1074 = vmatpush.bf16.msrb.mxu0 %v2236_v0  ;;  %v2272_v0 = vld [vmem:[#allocation2 + $0x100] sm:$0xff] }
  0x92   : > { %1486 = vmatpush.bf16.msrb.mxu2 %v2245_v60  ;;  %1588 = vmatpush.bf16.msrb.mxu3 %v2261_v42 }
  0x94   : > { %1424 = vmatpush.bf16.msrb.mxu1 %v2253_v45  ;;  %v3115_v45 = vunpack.c.l.b16 %v2623_v61  ;;  %v2273_v61 = vld [vmem:[#allocation2 + $0x108] sm:$0xff] }
  0x96   : > { %1487 = vmatpush.bf16.msrb.mxu2 %v2244_v46  ;;  %1589 = vmatpush.bf16.msrb.mxu3 %v2260_v37  ;;  %v1721_v53 = vld.sshfl [vmem:[#allocation1] sm:$0xff pattern:$0x73625140] }
  0x97   : > { %v529_v54 = vpop.permute.xlu2 %528 }
  0x98   : > { %v541_v17 = vsel %vm534_vm0, %v511_v12, %v529_v54  ;;  %1425 = vmatpush.bf16.msrb.mxu1 %v2252_v11  ;;  %v602_v12 = vsel %vm534_vm0, %v2994_v18, %v589_v52  ;;  %v2243_v54 = vld [vmem:[#allocation2 + $0x18] sm:$0xff]  ;;  %v781_v52 = vpack.c.b16 %v2684_v25, %v2713_v10  ;;  %v913_v10 = vunpack.c.l.b16 %v2694_v2  ;;  %v2256_v11 = vld [vmem:[#allocation2 + $0x80] sm:$0xff] }
  0x99   : > { %995 = vmatmul.bf16.vlgmr.msra.gmra.mxu3 %v541_v17 }
  0x9a   : > { %1488 = vmatpush.bf16.msrb.mxu2 %v2243_v54  ;;  %1590 = vmatpush.bf16.msrb.mxu3 %v2259_v26  ;;  %v914_v60 = vpack.c.b16 %v913_v10, %v3115_v45 }
  0x9c   : > { %1426 = vmatpush.bf16.msrb.mxu1 %v2251_v47 }
  0x9d   : > { %v789_v32 = vpop.permute.xlu1 %788 }
  0x9e   : > { %v798_v21 = vsel %vm534_vm0, %v779_v19, %v789_v32  ;;  %v587_v35 = vpop.permute.xlu0 %586  ;;  %v2242_v19 = vld [vmem:[#allocation2 + $0x10] sm:$0xff] }
  0x9f   : > { %884 = vmatmul.bf16.vlgmr.msra.gmra.mxu2 %v798_v21  ;;  %v598_v34 = vsel %vm534_vm0, %v2968_v15, %v587_v35  ;;  %v531_v48 = vpop.permute.xlu2 %530  ;;  %v3114_v21 = vunpack.c.l.b16 %v2665_v41  ;;  %v2240_v41 = vld [vmem:[#allocation2] sm:$0xff] }
  0xa0   : > { %685 = vmatmul.bf16.gmra.mxu0 %v598_v34  ;;  %v2982_v3 = vsel %vm534_vm0, %v512_v63, %v531_v48  ;;  %1427 = vmatpush.bf16.msrb.mxu1 %v2250_v9  ;;  %v2275_v34 = vld [vmem:[#allocation2 + $0x118] sm:$0xff]  ;;  %v2274_v48 = vld [vmem:[#allocation2 + $0x110] sm:$0xff] }
  0xa1   : > { %v3010_v31 = vpack.c.b16 %v574_v24, %v3114_v21  ;;  %1489 = vmatpush.bf16.msrb.mxu2 %v2242_v19  ;;  %v2258_v24 = vld [vmem:[#allocation2 + $0x90] sm:$0xff]  ;;  %v2267_v63 = vld [vmem:[#allocation2 + $0xd8] sm:$0xff] }
  0xa2   : > { %1591 = vmatpush.bf16.msrb.mxu3 %v2258_v24 }
  0xa4   : > { %1428 = vmatpush.bf16.msrb.mxu1 %v2249_v4 }
  0xa5   : > { %v527_v14 = vpop.permute.xlu1 %526  ;;  %1490 = vmatpush.bf16.msrb.mxu2 %v2241_v38 }
  0xa6   : > { %v537_v56 = vsel %vm534_vm0, %v510_v36, %v527_v14  ;;  %v791_v16 = vpop.permute.xlu0 %790  ;;  %v782_v14 = vpack.c.b16 %v2733_v40, %v2706_v28  ;;  %1592 = vmatpush.bf16.msrb.mxu3 %v2257_v33  ;;  %v2264_v28 = vld [vmem:[#allocation2 + $0xc0] sm:$0xff] }
  0xa7   : > { %757 = vmatmul.bf16.vlgmr.msra.gmra.mxu1 %v537_v56  ;;  %v802_v62 = vsel %vm534_vm0, %v780_v39, %v791_v16  ;;  %v795_v56 = vpop.permute.xlu2 %794 }
  0xa8   : > { %1429 = vmatpush.bf16.msrb.mxu1 %v2248_v20  ;;  %v810_v39 = vsel %vm534_vm0, %v782_v14, %v795_v56 }
  0xa9   : > { %1000 = vmatmul.bf16.gmra.mxu3 %v2982_v3  ;;  %1491 = vmatpush.bf16.msrb.mxu2 %v2240_v41 }
  0xaa   : > { %1593 = vmatpush.bf16.msrb.mxu3 %v2256_v11 }
  0xac   : > { %1689 = vmatpush.bf16.msra.mxu1 %v2271_v1 }
  0xad   : > { %v591_v6 = vpop.permute.xlu1 %590  ;;  %1752 = vmatpush.bf16.msra.mxu2 %v2275_v34 }
  0xae   : > { %v793_v32 = vpop.permute.xlu0 %792  ;;  %v606_v25 = vsel %vm534_vm0, %v3010_v31, %v591_v6 }
  0xaf   : > { %889 = vmatmul.bf16.gmra.mxu2 %v802_v62  ;;  %v806_v35 = vsel %vm534_vm0, %v781_v52, %v793_v32 }
  0xb0   : > { %690 = vmatmul.bf16.gmra.mxu0 %v602_v12 }
  0xb1   : > { %1753 = vmatpush.bf16.msra.mxu2 %v2274_v48 }
  0xb5   : > { %v533_v23 = vpop.permute.xlu1 %532  ;;  %1754 = vmatpush.bf16.msra.mxu2 %v2273_v61 }
  0xb6   : > { %v549_v49 = vsel %vm534_vm0, %v513_v58, %v533_v23 }
  0xb7   : > { %762 = vmatmul.bf16.gmra.mxu1 %v541_v17  ;;  %v2270_v17 = vld [vmem:[#allocation2 + $0xf0] sm:$0xff] }
  0xb8   : > { %1690 = vmatpush.bf16.msra.mxu1 %v2270_v17 }
  0xb9   : > { %1005 = vmatmul.bf16.gmra.mxu3 %v549_v49  ;;  %1755 = vmatpush.bf16.msra.mxu2 %v2272_v0 }
  0xba   : > { %v1354_v16 = vpop.permute.xlu2 %1353 }
  0xbb   : > { %v1356_v47 = vsel %vm534_vm0, %v2796_v13, %v1354_v16 }
  0xbc   : > { %1691 = vmatpush.bf16.msra.mxu1 %v2269_v51 }
  0xbd   : > { %v1312_v40 = vpop.permute.xlu1 %1311 }
  0xbe   : > { %v918_v36 = vpop.permute.xlu0 %917  ;;  %v1314_v46 = vsel %vm534_vm0, %v2502_v59, %v1312_v40  ;;  %v1900_v59 = vrot.slane %v2694_v2, 9 }
  0xbf   : > { %894 = vmatmul.bf16.gmra.mxu2 %v806_v35  ;;  %v921_v7 = vsel %vm534_vm0, %v914_v60, %v918_v36 }
  0xc0   : > { %695 = vmatmul.bf16.gmra.mxu0 %v606_v25  ;;  %1692 = vmatpush.bf16.msra.mxu1 %v2268_v50 }
  0xc4   : > { %1693 = vmatpush.bf16.msra.mxu1 %v2267_v63 }
  0xc7   : > { %767 = vmatmul.bf16.gmra.mxu1 %v2982_v3  ;;  %v2265_v3 = vld [vmem:[#allocation2 + $0xc8] sm:$0xff] }
  0xc8   : > { %1694 = vmatpush.bf16.msra.mxu1 %v2266_v22 }
  0xc9   : > { %1010 = vmatmul.bf16.gmra.mxu3 %v921_v7 }
  0xcc   : > { %1695 = vmatpush.bf16.msra.mxu1 %v2265_v3 }
  0xcf   : > { %899 = vmatmul.bf16.gmra.mxu2 %v810_v39 }
  0xd0   : > { %2045 = vmatmul.msk.bf16.vlgmr.msrb.gmra.mxu0 %vm534_vm0, %v2968_v15  ;;  %1696 = vmatpush.bf16.msra.mxu1 %v2264_v28 }
  0xd7   : > { %772 = vmatmul.bf16.gmra.mxu1 %v549_v49 }
  0xdf   : > { %1492 = vmatmul.bf16.vlgmr.msrb.gmra.mxu2 %v1314_v46 }
  0xe0   : > { %2046 = vmatmul.msk.bf16.gmra.mxu0 %vm534_vm0, %v2994_v18  ;;  %v501_v18 = vsel %vm2520_vm13, %v1900_v59, %v500_v8 }
  0xe1   : > { %v1032_v13 = vunpack.c.l.b16 %v501_v18 }
  0xe3   : > { %v1033_v62 = vpack.c.b16 %v1032_v13, %v783_v29 }
  0xe7   : > { %1430 = vmatmul.bf16.vlgmr.msrb.gmra.mxu1 %v1356_v47 }
  0xe8   : > { %v1518_v42 = vpop.permute.xlu0 %1517 }
  0xe9   : > { %v1520_v15 = vsel %vm534_vm0, %v2830_v55, %v1518_v42 }
  0xea   : > { %1594 = vmatmul.bf16.vlgmr.msrb.gmra.mxu3 %v1520_v15 }
  0xef   : > { %2199 = vmatmul.msk.bf16.vlgmr.msra.gmra.mxu2 %vm534_vm0, %v1721_v53 }
  0xf0   : > { %2047 = vmatmul.msk.bf16.gmra.mxu0 %vm534_vm0, %v3010_v31 }
  0xfe   : > { %v1621_v6 = vpop.permute.xlu1 %1620 }
  0xff   : > { %v1623_v55 = vsel %vm534_vm0, %v2916_v27, %v1621_v6 }
 0x100   : > { %1697 = vmatmul.bf16.vlgmr.msra.gmra.mxu1 %v1623_v55  ;;  %2048 = vmatmul.msk.bf16.gmra.mxu0 %vm534_vm0, %v1033_v62 }
 0x108   : > { %v681_v9 = vpop.f32.mrf.mxu0 }
 0x110   : > { %v683_v12 = vpop.f32.mrf.mxu0 }
 0x11c   : > { %v996_v44 = vpop.f32.mrf.mxu3 }
 0x11d   : > { %v686_v54 = vpop.f32.mrf.mxu0 }
 0x122   : > { %v885_v2 = vpop.f32.mrf.mxu2 }
 0x124   : > { %v758_v4 = vpop.f32.mrf.mxu1  ;;  %v998_v57 = vpop.f32.mrf.mxu3 }
 0x125   : > { %v688_v5 = vpop.f32.mrf.mxu0  ;;  %v759_v37 = vadd.f32 %v758_v4, %v681_v9 }
 0x127   : > { %v905_v38 = vadd.f32 %v885_v2, %v759_v37 }
 0x129   : > { %v1016_v26 = vadd.f32 %v996_v44, %v905_v38 }
 0x12a   : > { %v887_v30 = vpop.f32.mrf.mxu2 }
 0x12c   : > { %v760_v43 = vpop.f32.mrf.mxu1  ;;  %v1001_v27 = vpop.f32.mrf.mxu3 }
 0x12d   : > { %v691_v58 = vpop.f32.mrf.mxu0  ;;  %v761_v35 = vadd.f32 %v760_v43, %v683_v12 }
 0x12f   : > { %v906_v24 = vadd.f32 %v887_v30, %v761_v35 }
 0x131   : > { %v1017_v45 = vadd.f32 %v998_v57, %v906_v24 }
 0x132   : > { %v890_v29 = vpop.f32.mrf.mxu2 }
 0x134   : > { %v763_v23 = vpop.f32.mrf.mxu1  ;;  %v1003_v21 = vpop.f32.mrf.mxu3 }
 0x135   : > { %v693_v49 = vpop.f32.mrf.mxu0  ;;  %v764_v60 = vadd.f32 %v763_v23, %v686_v54 }
 0x137   : > { %v907_v33 = vadd.f32 %v890_v29, %v764_v60 }
 0x139   : > { %v1018_v48 = vadd.f32 %v1001_v27, %v907_v33 }
 0x13a   : > { %v892_v20 = vpop.f32.mrf.mxu2 }
 0x13c   : > { %v765_v19 = vpop.f32.mrf.mxu1  ;;  %v1006_v51 = vpop.f32.mrf.mxu3 }
 0x13d   : > { %v696_v1 = vpop.f32.mrf.mxu0  ;;  %v766_v14 = vadd.f32 %v765_v19, %v688_v5 }
 0x13f   : > { %v908_v39 = vadd.f32 %v892_v20, %v766_v14 }
 0x141   : > { %v1019_v3 = vadd.f32 %v1003_v21, %v908_v39 }
 0x142   : > { %v895_v52 = vpop.f32.mrf.mxu2 }
 0x144   : > { %v768_v32 = vpop.f32.mrf.mxu1  ;;  %v1008_v63 = vpop.f32.mrf.mxu3 }
 0x145   : > { %v698_v31 = vpop.f32.mrf.mxu0  ;;  %v769_v28 = vadd.f32 %v768_v32, %v691_v58 }
 0x147   : > { %v909_v47 = vadd.f32 %v895_v52, %v769_v28 }
 0x149   : > { %v1020_v15 = vadd.f32 %v1006_v51, %v909_v47 }
 0x14a   : > { %v897_v17 = vpop.f32.mrf.mxu2 }
 0x14c   : > { %v770_v25 = vpop.f32.mrf.mxu1  ;;  %v1011_v0 = vpop.f32.mrf.mxu3 }
 0x14d   : > { %v1076_v10 = vpop.f32.mrf.mxu0  ;;  %v771_v53 = vadd.f32 %v770_v25, %v693_v49 }
 0x14e   : > { %v1096_v41 = vadd.f32 %v1076_v10, %v1016_v26 }
 0x14f   : > { %v910_v13 = vadd.f32 %v897_v17, %v771_v53 }
 0x150   : > { %1104 = vst [vmem:[%s3049_s20] sm:$0xff] %v1096_v41 }
 0x151   : > { %v1021_v55 = vadd.f32 %v1008_v63, %v910_v13 }
 0x152   : > { %v900_v34 = vpop.f32.mrf.mxu2 }
 0x154   : > { %v773_v50 = vpop.f32.mrf.mxu1  ;;  %v1013_v59 = vpop.f32.mrf.mxu3 }
 0x155   : > { %v1078_v36 = vpop.f32.mrf.mxu0  ;;  %v774_v9 = vadd.f32 %v773_v50, %v696_v1 }
 0x156   : > { %v1097_v7 = vadd.f32 %v1078_v36, %v1017_v45 }
 0x157   : > { %v911_v5 = vadd.f32 %v900_v34, %v774_v9 }
 0x158   : > { %1105 = vst [vmem:[%s3049_s20 + $0x8] sm:$0xff] %v1097_v7 }
 0x159   : > { %v1022_v43 = vadd.f32 %v1011_v0, %v911_v5 }
 0x15a   : > { %v902_v56 = vpop.f32.mrf.mxu2 }
 0x15c   : > { %v775_v22 = vpop.f32.mrf.mxu1 }
 0x15d   : > { %v1081_v61 = vpop.f32.mrf.mxu0  ;;  %v776_v58 = vadd.f32 %v775_v22, %v698_v31 }
 0x15e   : > { %v1098_v11 = vadd.f32 %v1081_v61, %v1018_v48 }
 0x15f   : > { %v912_v19 = vadd.f32 %v902_v56, %v776_v58 }
 0x160   : > { %1106 = vst [vmem:[%s3049_s20 + $0x10] sm:$0xff] %v1098_v11 }
 0x161   : > { %v1023_v37 = vadd.f32 %v1013_v59, %v912_v19 }
 0x162   : > { %v1493_v46 = vpop.f32.mrf.mxu2 }
 0x164   : > { %v1431_v42 = vpop.f32.mrf.mxu1 }
 0x165   : > { %v1083_v40 = vpop.f32.mrf.mxu0  ;;  %v1494_v2 = vadd.f32 %v1493_v46, %v1431_v42 }
 0x166   : > { %v1099_v16 = vadd.f32 %v1083_v40, %v1019_v3 }
 0x168   : > { %1107 = vst [vmem:[%s3049_s20 + $0x18] sm:$0xff] %v1099_v16 }
 0x16a   : > { %v1495_v62 = vpop.f32.mrf.mxu2 }
 0x16c   : > { %v1433_v6 = vpop.f32.mrf.mxu1 }
 0x16d   : > { %v1086_v8 = vpop.f32.mrf.mxu0  ;;  %v1595_v12 = vpop.f32.mrf.mxu3  ;;  %v1496_v23 = vadd.f32 %v1495_v62, %v1433_v6 }
 0x16e   : > { %v1100_v18 = vadd.f32 %v1086_v8, %v1020_v15  ;;  %v1600_v44 = vadd.f32 %v1595_v12, %v1494_v2 }
 0x170   : > { %1108 = vst [vmem:[%s3049_s20 + $0x20] sm:$0xff] %v1100_v18 }
 0x172   : > { %v1757_v30 = vpop.f32.mrf.mxu2 }
 0x175   : > { %v1088_v54 = vpop.f32.mrf.mxu0  ;;  %v1597_v27 = vpop.f32.mrf.mxu3 }
 0x176   : > { %v1101_v4 = vadd.f32 %v1088_v54, %v1021_v55  ;;  %v1601_v52 = vadd.f32 %v1597_v27, %v1496_v23 }
 0x178   : > { %1109 = vst [vmem:[%s3049_s20 + $0x28] sm:$0xff] %v1101_v4 }
 0x17a   : > { %v1759_v32 = vpop.f32.mrf.mxu2 }
 0x17d   : > { %v1698_v57 = vpop.f32.mrf.mxu1  ;;  %v1091_v29 = vpop.f32.mrf.mxu0 }
 0x17e   : > { %v1703_v49 = vadd.f32 %v1698_v57, %v1600_v44  ;;  %v1102_v20 = vadd.f32 %v1091_v29, %v1022_v43 }
 0x180   : > { %v1762_v1 = vadd.f32 %v1757_v30, %v1703_v49  ;;  %1110 = vst [vmem:[%s3049_s20 + $0x30] sm:$0xff] %v1102_v20 }
 0x182   : > { %1764 = vst [vmem:[%s274_s25] sm:$0xff] %v1762_v1 }
 0x185   : > { %v1700_v21 = vpop.f32.mrf.mxu1  ;;  %v1093_v31 = vpop.f32.mrf.mxu0 }
 0x186   : > { %v1704_v38 = vadd.f32 %v1700_v21, %v1601_v52  ;;  %v1103_v17 = vadd.f32 %v1093_v31, %v1023_v37 }
 0x188   : > { %v1763_v26 = vadd.f32 %v1759_v32, %v1704_v38  ;;  %1111 = vst [vmem:[%s3049_s20 + $0x38] sm:$0xff] %v1103_v17 }
 0x18a   : > { %1765 = vst [vmem:[%s274_s25 + $0x8] sm:$0xff] %v1763_v26 }
 0x18b PF: > { %s17_s18 = sadd.s32 1, %s2340_s18  }
 0x18c   : > { %p14_p7 = scmp.ge.s32.totalorder %s17_s18, 4  }
 0x18e   :  { %16 = sbr.rel (!%p14_p7) target bundleno = 1 (0x1), region = 113 }
 0x193   :  { %1803 = vsyncpa [#allocation3], 1 }
 0x194   :  { %1805 = vsyncpa [#allocation3 + $0x1], 1 }

</bundles_post_ra>
